<compile_context>
chip_gen: v5e
topology: v5e:2x2
jax: 0.10.0
libtpu: 0.0.40
codegen_flags: <defaults>
</compile_context>

<pallas_src>
import jax
import jax.numpy as jnp
from jax import lax
from jax.experimental import pallas as pl
from jax.experimental.pallas import tpu as pltpu

NEG_INF = -1e30  # finite "-inf": avoids exp(-inf - -inf) NaNs on masked rows
VMEM_LIMIT_BYTES = 64 * 1024 * 1024  # > default scoped 16/32 MiB, <= v7x 64 MiB physical


# ----------------------------------------------------------------------------
# Kernel 1: fused QKV projection (bf16 matmul, f32 accumulation)
# ----------------------------------------------------------------------------
def qkv_proj_kernel(x_ref, wqkv_ref, bqkv_ref, q_ref, kt_ref, v_ref):
    # x_ref   : (1, tq, d_in)   bf16
    # wqkv_ref: (d_in, 3*E)     bf16  (Q slice pre-scaled by 1/sqrt(hd))
    # bqkv_ref: (1, 3*E)        f32
    # q_ref   : (1, H, tq, hd)  bf16  head-major
    # kt_ref  : (1, H, hd, tq)  bf16  head-major, K pre-transposed (lane-dense over T)
    # v_ref   : (1, H, tq, hd)  bf16
    _, num_heads, tq, hd = q_ref.shape
    E = num_heads * hd

    qkv = jnp.dot(x_ref[0], wqkv_ref[...],
                  preferred_element_type=jnp.float32) + bqkv_ref[...]   # (tq, 3E) f32

    # Cast to bf16 BEFORE the head-major relayouts (halves XLU/vreg traffic).
    q = qkv[:, :E].astype(jnp.bfloat16).reshape(tq, num_heads, hd)
    k = qkv[:, E:2 * E].astype(jnp.bfloat16).reshape(tq, num_heads, hd)
    v = qkv[:, 2 * E:].astype(jnp.bfloat16).reshape(tq, num_heads, hd)

    q_ref[0] = q.transpose(1, 0, 2)    # (H, tq, hd)
    kt_ref[0] = k.transpose(1, 2, 0)   # (H, hd, tq)  K transposed once, here
    v_ref[0] = v.transpose(1, 0, 2)    # (H, tq, hd)


def qkv_projection(x_bf16, wqkv_bf16, bqkv, num_heads, head_dim, tq):
    B, T, d_in = x_bf16.shape
    d3 = wqkv_bf16.shape[1]
    E = d3 // 3
    nq = T // tq

    flops = 2 * B * T * d_in * d3
    bytes_accessed = (x_bf16.size * 2 + wqkv_bf16.size * 2 + bqkv.size * 4
                      + 3 * B * T * E * 2)

    qv_spec = pl.BlockSpec((1, num_heads, tq, head_dim), lambda b, i: (b, 0, i, 0))
    kt_spec = pl.BlockSpec((1, num_heads, head_dim, tq), lambda b, i: (b, 0, 0, i))

    return pl.pallas_call(
        qkv_proj_kernel,
        out_shape=(
            jax.ShapeDtypeStruct((B, num_heads, T, head_dim), jnp.bfloat16),
            jax.ShapeDtypeStruct((B, num_heads, head_dim, T), jnp.bfloat16),
            jax.ShapeDtypeStruct((B, num_heads, T, head_dim), jnp.bfloat16),
        ),
        grid=(B, nq),
        in_specs=[
            pl.BlockSpec((1, tq, d_in), lambda b, i: (b, i, 0)),
            # TODO(synk): for very large d_in/E (v7x 64 MiB VMEM) tile the fused
            #             weight along K or N with an extra grid axis instead of
            #             holding it resident for the whole grid.
            pl.BlockSpec((d_in, d3), lambda b, i: (0, 0)),
            pl.BlockSpec((1, d3), lambda b, i: (0, 0)),
        ],
        out_specs=(qv_spec, kt_spec, qv_spec),
        compiler_params=pltpu.CompilerParams(
            dimension_semantics=("parallel", "parallel"),
            vmem_limit_bytes=VMEM_LIMIT_BYTES),
        cost_estimate=pl.CostEstimate(
            flops=flops, transcendentals=0, bytes_accessed=bytes_accessed),
    )(x_bf16, wqkv_bf16, bqkv)


# ----------------------------------------------------------------------------
# Kernel 2: flash-style causal attention + fused output projection
# grid = (B, num_q_tiles, num_kv_tiles); kv is the "arbitrary" reduction axis
# ----------------------------------------------------------------------------
def flash_attn_kernel(q_ref, kt_ref, v_ref, wo_ref, bo_ref, o_ref,
                      m_sc, l_sc, acc_sc):
    _, H, tq, hd = q_ref.shape
    tk = kt_ref.shape[3]
    i = pl.program_id(1)           # q-tile index
    j = pl.program_id(2)           # kv-tile index
    nk = pl.num_programs(2)

    @pl.when(j == 0)
    def _init():
        m_sc[...] = jnp.full_like(m_sc, NEG_INF)
        l_sc[...] = jnp.zeros_like(l_sc)
        acc_sc[...] = jnp.zeros_like(acc_sc)

    def scores():
        # (H, tq, tk) f32; kt tile is (H, hd, tk) -> plain NN contraction, no
        # per-step K relayout needed.
        return jnp.einsum('hqd,hdk->hqk', q_ref[0], kt_ref[0],
                          preferred_element_type=jnp.float32)

    def online_update(s):
        m_prev = m_sc[...]                                          # (H, tq, 1)
        m_new = jnp.maximum(m_prev, jnp.max(s, axis=-1, keepdims=True))
        alpha = jnp.exp(m_prev - m_new)
        p = jnp.exp(s - m_new)                                      # (H, tq, tk) f32
        l_sc[...] = alpha * l_sc[...] + jnp.sum(p, axis=-1, keepdims=True)
        acc_sc[...] = alpha * acc_sc[...] + jnp.einsum(
            'hqk,hkd->hqd', p.astype(jnp.bfloat16), v_ref[0],
            preferred_element_type=jnp.float32)
        m_sc[...] = m_new
        # TODO(synk): m/l could be lane-replicated (trailing dim 128) for slightly
        #             denser VPU work; kept (H,tq,1) for simplicity.

    row0 = i * tq
    col0 = j * tk
    below_diag = col0 + (tk - 1) <= row0                       # tile fully unmasked
    crosses_diag = jnp.logical_and(col0 <= row0 + (tq - 1),    # tile not fully masked
                                   jnp.logical_not(below_diag))
    # Tiles strictly above the diagonal fall into neither branch: compute skipped
    # (and the clamped K/V index_maps mean they cost no DMA either).

    @pl.when(below_diag)
    def _full_tile():                      # mask-free fast path
        online_update(scores())

    @pl.when(crosses_diag)
    def _diag_tile():                      # only diagonal-crossing tiles pay the mask
        s = scores()
        row = row0 + lax.broadcasted_iota(jnp.int32, (tq, tk), 0)
        col = col0 + lax.broadcasted_iota(jnp.int32, (tq, tk), 1)
        online_update(jnp.where((col > row)[None, :, :], NEG_INF, s))

    @pl.when(j == nk - 1)
    def _finalize():
        inv_l = pl.reciprocal(l_sc[...], approx=True)               # EUP, ~free
        ctx = (acc_sc[...] * inv_l).astype(jnp.bfloat16)            # cast before relayout
        ctx = ctx.transpose(1, 0, 2).reshape(tq, H * hd)            # (tq, E) bf16
        out = jnp.dot(ctx, wo_ref[...],
                      preferred_element_type=jnp.float32) + bo_ref[...]
        o_ref[0] = out.astype(o_ref.dtype)


def flash_attention(q, kt, v, wo_bf16, bo, tq, tk, out_dtype=jnp.float32):
    B, H, T, hd = q.shape
    E = H * hd
    nq, nk = T // tq, T // tk

    def kv_block(i, j):
        # Last kv tile this q tile actually needs (causal). Clamping the block
        # index makes above-diagonal steps re-reference the previous block, so
        # the pipeline issues no new K/V DMA for skipped tiles.
        j_last = (i * tq + (tq - 1)) // tk
        return jnp.minimum(j, j_last)

    flops = 2 * B * H * T * T * hd + 2 * B * T * E * E   # ~causal half of dense attn
    transcendentals = B * H * T * T // 2
    bytes_accessed = (q.size + kt.size + v.size) * 2 + wo_bf16.size * 2 \
        + bo.size * 4 + B * T * E * 4

    return pl.pallas_call(
        flash_attn_kernel,
        out_shape=jax.ShapeDtypeStruct((B, T, E), out_dtype),
        grid=(B, nq, nk),
        in_specs=[
            pl.BlockSpec((1, H, tq, hd), lambda b, i, j: (b, 0, i, 0)),
            pl.BlockSpec((1, H, hd, tk), lambda b, i, j: (b, 0, 0, kv_block(i, j))),
            pl.BlockSpec((1, H, tk, hd), lambda b, i, j: (b, 0, kv_block(i, j), 0)),
            # TODO(synk): if (E,E) bf16 pressures v7x's 64 MiB VMEM at large E,
            #             tile Wo along N (extra grid axis) or un-fuse the output
            #             projection into its own pallas_call.
            pl.BlockSpec((E, E), lambda b, i, j: (0, 0)),
            pl.BlockSpec((1, E), lambda b, i, j: (0, 0)),
        ],
        out_specs=pl.BlockSpec((1, tq, E), lambda b, i, j: (b, i, 0)),
        scratch_shapes=[
            pltpu.VMEM((H, tq, 1), jnp.float32),    # running max m
            pltpu.VMEM((H, tq, 1), jnp.float32),    # running denom l
            pltpu.VMEM((H, tq, hd), jnp.float32),   # running numerator acc
        ],
        compiler_params=pltpu.CompilerParams(
            dimension_semantics=("parallel", "parallel", "arbitrary"),
            vmem_limit_bytes=VMEM_LIMIT_BYTES),
        cost_estimate=pl.CostEstimate(
            flops=flops, transcendentals=transcendentals,
            bytes_accessed=bytes_accessed),
    )(q, kt, v, wo_bf16, bo)


# ----------------------------------------------------------------------------
# Module-level forward (PyTorch MultiHeadAttention.forward, eval mode)
# ----------------------------------------------------------------------------
def multi_head_attention(x, params, num_heads, *, tq=None, tk=None):
    B, T, d_in = x.shape
    d_out = params['wo'].shape[0]
    hd = d_out // num_heads

    # 256 fills the 256-wide MXU M dim on v6e/v7x; pass tq=tk=128 on v5e.
    if tq is None:
        tq = T if T <= 256 else 256
    if tk is None:
        tk = T if T <= 256 else 256
    assert T % tq == 0 and T % tk == 0, "sequence length must be divisible by tile size"

    # Host-side weight prep: fuse Wq/Wk/Wv, fold 1/sqrt(hd) into the Q slice,
    # cast weights to bf16 for the MXU (accumulation stays f32 inside kernels).
    scale = 1.0 / jnp.sqrt(jnp.float32(hd))
    wqkv = jnp.concatenate(
        [params['wq'] * scale, params['wk'], params['wv']], axis=1
    ).astype(jnp.bfloat16)
    bqkv = jnp.concatenate(
        [params['bq'] * scale, params['bk'], params['bv']], axis=0
    ).reshape(1, 3 * d_out).astype(jnp.float32)
    wo = params['wo'].astype(jnp.bfloat16)
    bo = params['bo'].reshape(1, d_out).astype(jnp.float32)

    # bf16 activations on the wire: halves QKV-kernel HBM traffic; the kernel
    # already accumulated in f32, so numerics are unchanged.
    x_bf16 = x.astype(jnp.bfloat16)

    q, kt, v = qkv_projection(x_bf16, wqkv, bqkv, num_heads, hd, tq)
    # TODO(synk): attention-weight dropout (rate > 0, training mode) not implemented;
    #             eval-mode / drop_rate = 0 identity semantics are used.
    return flash_attention(q, kt, v, wo, bo, tq, tk)


# ----------------------------------------------------------------------------
# Plain-JAX reference (mirrors the PyTorch module) for correctness checking
# ----------------------------------------------------------------------------
def mha_reference(x, params, num_heads):
    B, T, d_in = x.shape
    d_out = params['wo'].shape[0]
    hd = d_out // num_heads

    q = x @ params['wq'] + params['bq']
    k = x @ params['wk'] + params['bk']
    v = x @ params['wv'] + params['bv']

    def heads(m):
        return m.reshape(B, T, num_heads, hd).transpose(0, 2, 1, 3)

    q, k, v = heads(q), heads(k), heads(v)
    s = jnp.einsum('bhqd,bhkd->bhqk', q, k)
    mask = jnp.triu(jnp.ones((T, T), dtype=bool), k=1)
    s = jnp.where(mask[None, None], -jnp.inf, s)
    w = jax.nn.softmax(s / jnp.sqrt(jnp.float32(hd)), axis=-1)
    ctx = jnp.einsum('bhqk,bhkd->bhqd', w, v).transpose(0, 2, 1, 3).reshape(B, T, d_out)
    return ctx @ params['wo'] + params['bo']


if __name__ == "__main__":
    key = jax.random.PRNGKey(0)
    B, T = 2, 8
    d_in, d_out, num_heads = 32, 32, 4     # head_dim = 8
    k1, k2, k3, k4, k5, kx = jax.random.split(key, 6)

    params = {
        # Linear weights stored pre-transposed as (in, out): y = x @ W + b
        'wq': 0.02 * jax.random.normal(k1, (d_in, d_out), jnp.float32),
        'wk': 0.02 * jax.random.normal(k2, (d_in, d_out), jnp.float32),
        'wv': 0.02 * jax.random.normal(k3, (d_in, d_out), jnp.float32),
        'bq': jnp.zeros((d_out,), jnp.float32),   # qkv_bias=False
        'bk': jnp.zeros((d_out,), jnp.float32),
        'bv': jnp.zeros((d_out,), jnp.float32),
        'wo': 0.02 * jax.random.normal(k4, (d_out, d_out), jnp.float32),
        'bo': 0.02 * jax.random.normal(k5, (d_out,), jnp.float32),
    }
    x = jax.random.normal(kx, (B, T, d_in), jnp.float32)

    out = multi_head_attention(x, params, num_heads)
    out = jax.block_until_ready(out)

    assert out.shape == (B, T, d_out)
    assert bool(jnp.all(jnp.isfinite(out)))

    ref = mha_reference(x, params, num_heads)
    max_err = float(jnp.max(jnp.abs(out - ref)))
    assert max_err < 2e-2, f"max abs error vs reference: {max_err}"

    print("KERNEL_OK")
</pallas_src>

<mosaic_0001>
module attributes {stable_mosaic.version = 11 : i64} {
  func.func @qkv_proj_kernel(%arg0: i32, %arg1: i32, %arg2: memref<1x8x32xbf16, #tpu.memory_space<vmem>>, %arg3: memref<32x96xbf16, #tpu.memory_space<vmem>>, %arg4: memref<1x96xf32, #tpu.memory_space<vmem>>, %arg5: memref<1x4x8x8xbf16, #tpu.memory_space<vmem>>, %arg6: memref<1x4x8x8xbf16, #tpu.memory_space<vmem>>, %arg7: memref<1x4x8x8xbf16, #tpu.memory_space<vmem>>) attributes {dimension_semantics = [#tpu.dimension_semantics<parallel>, #tpu.dimension_semantics<parallel>], iteration_bounds = array<i64: 2, 1>, scalar_prefetch = 0 : i64, scratch_operands = 0 : i64, tpu.core_type = #tpu.core_type<tc>, window_params = [{transform_indices = @transform_0, window_bounds = array<i64: 1, 8, 32>}, {pipeline_mode = #tpu.pipeline_mode<synchronous>, transform_indices = @transform_1, window_bounds = array<i64: 32, 96>}, {pipeline_mode = #tpu.pipeline_mode<synchronous>, transform_indices = @transform_2, window_bounds = array<i64: 1, 96>}, {transform_indices = @transform_3, window_bounds = array<i64: 1, 4, 8, 8>}, {transform_indices = @transform_4, window_bounds = array<i64: 1, 4, 8, 8>}, {transform_indices = @transform_5, window_bounds = array<i64: 1, 4, 8, 8>}]} {
    %c0 = arith.constant 0 : index
    %c0_0 = arith.constant 0 : index
    %c0_1 = arith.constant 0 : index
    %0 = vector.load %arg2[%c0, %c0_0, %c0_1] : memref<1x8x32xbf16, #tpu.memory_space<vmem>>, vector<1x8x32xbf16>
    %1 = vector.shape_cast %0 : vector<1x8x32xbf16> to vector<8x32xbf16>
    %c0_2 = arith.constant 0 : index
    %c0_3 = arith.constant 0 : index
    %2 = vector.load %arg3[%c0_2, %c0_3] : memref<32x96xbf16, #tpu.memory_space<vmem>>, vector<32x96xbf16>
    %cst = arith.constant dense<0.000000e+00> : vector<8x96xf32>
    %3 = tpu.matmul %1, %2, %cst {dimension_numbers = #tpu.dot_dimension_numbers<[1], [0], [0], [1], [0, 0, 1, 1], [], []>} : vector<8x32xbf16>, vector<32x96xbf16>, vector<8x96xf32> -> vector<8x96xf32>
    %c0_4 = arith.constant 0 : index
    %c0_5 = arith.constant 0 : index
    %4 = vector.load %arg4[%c0_4, %c0_5] : memref<1x96xf32, #tpu.memory_space<vmem>>, vector<1x96xf32>
    %5 = vector.broadcast %4 : vector<1x96xf32> to vector<8x96xf32>
    %6 = arith.addf %3, %5 : vector<8x96xf32>
    %7 = vector.extract_strided_slice %6 {offsets = [0, 0], sizes = [8, 32], strides = [1, 1]} : vector<8x96xf32> to vector<8x32xf32>
    %8 = arith.truncf %7 : vector<8x32xf32> to vector<8x32xbf16>
    %9 = vector.shape_cast %8 : vector<8x32xbf16> to vector<8x4x8xbf16>
    %10 = vector.extract_strided_slice %6 {offsets = [0, 32], sizes = [8, 32], strides = [1, 1]} : vector<8x96xf32> to vector<8x32xf32>
    %11 = arith.truncf %10 : vector<8x32xf32> to vector<8x32xbf16>
    %12 = vector.shape_cast %11 : vector<8x32xbf16> to vector<8x4x8xbf16>
    %13 = vector.extract_strided_slice %6 {offsets = [0, 64], sizes = [8, 32], strides = [1, 1]} : vector<8x96xf32> to vector<8x32xf32>
    %14 = arith.truncf %13 : vector<8x32xf32> to vector<8x32xbf16>
    %15 = vector.shape_cast %14 : vector<8x32xbf16> to vector<8x4x8xbf16>
    %16 = tpu.transpose %9, [1, 0, 2] : vector<8x4x8xbf16> -> vector<4x8x8xbf16>
    %c0_6 = arith.constant 0 : index
    %c0_7 = arith.constant 0 : index
    %c0_8 = arith.constant 0 : index
    %c0_9 = arith.constant 0 : index
    %17 = vector.load %arg5[%c0_6, %c0_7, %c0_8, %c0_9] : memref<1x4x8x8xbf16, #tpu.memory_space<vmem>>, vector<1x4x8x8xbf16>
    %18 = vector.shape_cast %17 : vector<1x4x8x8xbf16> to vector<4x8x8xbf16>
    %19 = vector.shape_cast %16 : vector<4x8x8xbf16> to vector<1x4x8x8xbf16>
    tpu.vector_store %arg5[%c0_6, %c0_7, %c0_8, %c0_9], %19 {strides = array<i32>} : memref<1x4x8x8xbf16, #tpu.memory_space<vmem>>, vector<1x4x8x8xbf16>,
    %20 = tpu.transpose %12, [1, 2, 0] : vector<8x4x8xbf16> -> vector<4x8x8xbf16>
    %c0_10 = arith.constant 0 : index
    %c0_11 = arith.constant 0 : index
    %c0_12 = arith.constant 0 : index
    %c0_13 = arith.constant 0 : index
    %21 = vector.load %arg6[%c0_10, %c0_11, %c0_12, %c0_13] : memref<1x4x8x8xbf16, #tpu.memory_space<vmem>>, vector<1x4x8x8xbf16>
    %22 = vector.shape_cast %21 : vector<1x4x8x8xbf16> to vector<4x8x8xbf16>
    %23 = vector.shape_cast %20 : vector<4x8x8xbf16> to vector<1x4x8x8xbf16>
    tpu.vector_store %arg6[%c0_10, %c0_11, %c0_12, %c0_13], %23 {strides = array<i32>} : memref<1x4x8x8xbf16, #tpu.memory_space<vmem>>, vector<1x4x8x8xbf16>,
    %24 = tpu.transpose %15, [1, 0, 2] : vector<8x4x8xbf16> -> vector<4x8x8xbf16>
    %c0_14 = arith.constant 0 : index
    %c0_15 = arith.constant 0 : index
    %c0_16 = arith.constant 0 : index
    %c0_17 = arith.constant 0 : index
    %25 = vector.load %arg7[%c0_14, %c0_15, %c0_16, %c0_17] : memref<1x4x8x8xbf16, #tpu.memory_space<vmem>>, vector<1x4x8x8xbf16>
    %26 = vector.shape_cast %25 : vector<1x4x8x8xbf16> to vector<4x8x8xbf16>
    %27 = vector.shape_cast %24 : vector<4x8x8xbf16> to vector<1x4x8x8xbf16>
    tpu.vector_store %arg7[%c0_14, %c0_15, %c0_16, %c0_17], %27 {strides = array<i32>} : memref<1x4x8x8xbf16, #tpu.memory_space<vmem>>, vector<1x4x8x8xbf16>,
    return
  }
  func.func @transform_0(%arg0: i32, %arg1: i32) -> (i32, i32, i32) {
    %c0_i32 = arith.constant 0 : i32
    %c0_i32_0 = arith.constant 0 : i32
    return %arg0, %arg1, %c0_i32 : i32, i32, i32
  }
  func.func @transform_1(%arg0: i32, %arg1: i32) -> (i32, i32) {
    %c0_i32 = arith.constant 0 : i32
    %c0_i32_0 = arith.constant 0 : i32
    %c0_i32_1 = arith.constant 0 : i32
    return %c0_i32, %c0_i32_0 : i32, i32
  }
  func.func @transform_2(%arg0: i32, %arg1: i32) -> (i32, i32) {
    %c0_i32 = arith.constant 0 : i32
    %c0_i32_0 = arith.constant 0 : i32
    %c0_i32_1 = arith.constant 0 : i32
    return %c0_i32, %c0_i32_0 : i32, i32
  }
  func.func @transform_3(%arg0: i32, %arg1: i32) -> (i32, i32, i32, i32) {
    %c0_i32 = arith.constant 0 : i32
    %c0_i32_0 = arith.constant 0 : i32
    %c0_i32_1 = arith.constant 0 : i32
    return %arg0, %c0_i32, %arg1, %c0_i32_0 : i32, i32, i32, i32
  }
  func.func @transform_4(%arg0: i32, %arg1: i32) -> (i32, i32, i32, i32) {
    %c0_i32 = arith.constant 0 : i32
    %c0_i32_0 = arith.constant 0 : i32
    %c0_i32_1 = arith.constant 0 : i32
    return %arg0, %c0_i32, %c0_i32_0, %arg1 : i32, i32, i32, i32
  }
  func.func @transform_5(%arg0: i32, %arg1: i32) -> (i32, i32, i32, i32) {
    %c0_i32 = arith.constant 0 : i32
    %c0_i32_0 = arith.constant 0 : i32
    %c0_i32_1 = arith.constant 0 : i32
    return %arg0, %c0_i32, %arg1, %c0_i32_0 : i32, i32, i32, i32
  }
}

</mosaic_0001>

<bundles_post_ra>
// kernel: tpu_custom_call.1
= control target key start
LH: loop header
LB: loop body
LE: loop exit
PB: predicated region body
PF: predicated region fallthrough
CT: control target
= control target key end

     0   :  { %s2063_s0 = inlined_call_operand.hbm [shape: bf16[2,8,32], index: 0, kind: input, shape index: {}]   ;;  %s2064_s1 = inlined_call_operand.hbm [shape: bf16[32,96], index: 1, kind: input, shape index: {}]   ;;  %s2065_s2 = inlined_call_operand.vmem [shape: f32[1,96], index: 2, kind: input, shape index: {}]   ;;  %s2066_s3 = inlined_call_operand.hbm [shape: bf16[2,4,8,8], index: 3, kind: output, shape index: {0}]   ;;  %s2067_s4 = inlined_call_operand.hbm [shape: bf16[2,4,8,8], index: 4, kind: output, shape index: {1}]   ;;  %s2068_s5 = inlined_call_operand.hbm [shape: bf16[2,4,8,8], index: 5, kind: output, shape index: {2}]  }
   0x1   :  { %2072 = sst [smem:[#allocation15_spill]] %s2063_s0 }
   0x2   :  { %2073 = sst [smem:[#allocation16_spill]] %s2064_s1 }
   0x3   :  { %2074 = sst [smem:[#allocation17_spill]] %s2065_s2 }
   0x4   :  { %11 = vsyncpa [#allocation3], 0 }
   0x5   :  { %13 = vsyncpa [#allocation3 + $0x1], 0 }
   0x6   :  { %14 = vsyncpa [#allocation6], 0 }
   0x7   :  { %15 = vsyncpa [#allocation4], 0 }
   0x8   :  { %17 = vsyncpa [#allocation4 + $0x1], 0 }
   0x9   :  { %18 = vsyncpa [#allocation9], 0 }
   0xa   :  { %20 = vsyncpa [#allocation9 + $0x1], 0  ;;  %s1705_s18 = smov 0   ;;  %s1707_s19 = smov 0  }
   0xb   :  { %s1709_s20 = smov 0   ;;  %s1711_s21 = smov 0  }
   0xc   :  { %s1713_s22 = smov 0   ;;  %s1715_s23 = smov 0  }
   0xd LB: > { %s1736_s24 = sadd.s32 4294967295, %s1662_s23   ;;  %p1301_p0 = scmp.ge.s32.totalorder %s1662_s23, 1  ;;  %s1662_s23 = sphi %s1715_s23, %s26_s23   ;;  %s1658_s22 = sphi %s1713_s22, %s2089_s22   ;;  %s1654_s21 = sphi %s1711_s21, %s2088_s21   ;;  %s1650_s20 = sphi %s1709_s20, %s2087_s20   ;;  %s1646_s19 = sphi %s1707_s19, %s2086_s19   ;;  %s1642_s18 = sphi %s1705_s18, %s2085_s18  }
   0xe   : > { %p61_p1 = scmp.eq.s32.totalorder %s1736_s24, 0  ;;  %p197_p2 = scmp.lt.s32.totalorder %s1662_s23, 3 }
   0xf   : > { %s2075_s1 = sld [smem:[#allocation16_spill]]  ;;  %s1664_s29 = smov [#allocation5]  }
  0x10   : > { %p1744_p3 = pnand %p1301_p0, %p197_p2  ;;  %s210_s30 = sshll.u32 %s1664_s29, 4  ;;  %s211_s30 = int_to_ptr.vmem [resolvable:$true] %s210_s30 }
  0x11   : > { %p1303_p6 = scmp.ge.s32.totalorder %s1662_s23, 2  ;;  %s1665_s6 = smov 64  }
  0x12   : > { %p1349_p4 = pneg %p1744_p3  ;;  %s1666_s7 = smov 4  }
  0x13   : > { %s2069_s8 = sadd.s32 4294967294, %s1662_s23   ;;  %s38_s9 = sadd.s32 1, %s1658_s22 }
  0x14   : > { %p1350_p5 = pnand %p1349_p4, %p61_p1  ;;  %s47_s10 = sadd.s32 1, %s1650_s20 }
  0x15   : > { %s208_s27 = sshll.u32 %s2075_s1, 4  ;;  %p40_p7 = scmp.ge.s32.totalorder %s38_s9, 2  ;;  %s209_s27 = int_to_ptr.hbm [resolvable:$true] %s208_s27 }
  0x16   : > { %1352 = dma.hbm_to_vmem [thread:$0]  (!%p1350_p5), %s209_s27, 256, %s211_s30, [#allocation6], %s1665_s6, %s1665_s6, %s1666_s7  }
  0x17   : > { %p54_p8 = scmp.ne.s32.totalorder %s1650_s20, %s1646_s19  ;;  %p55_p9 = scmp.eq.s32.totalorder %s1662_s23, 0 }
  0x18   : > { %p60_p10 = scmp.ne.s32.totalorder %s1646_s19, %s1642_s18  ;;  %s2091_s9 = smov (%p40_p7, %s38_s9), 0 }
  0x19   : > { %p1763_p11 = por %p55_p9, %p54_p8  ;;  %s42_s13 = ssub.s32 %s1658_s22, %s2091_s9 }
  0x1a   : > { %p1769_p12 = por %p61_p1, %p60_p10  ;;  %p128_p13 = scmp.eq.s32.totalorder %s1736_s24, 1 }
  0x1b   : > { %p45_p0 = scmp.eq.s32.totalorder %s42_s13, 0  ;;  %p134_p2 = scmp.eq.s32.totalorder %s2069_s8, 1 }
  0x1c   : > { %p1778_p4 = por %p128_p13, %p54_p8  ;;  %p1368_p5 = scmp.lt.s32.totalorder %s1662_s23, 2 }
  0x1d   : > { %s1784_s15 = scalar_select %p45_p0, %s1650_s20, %s47_s10  }
  0x1e   : > { %p1786_p7 = por %p134_p2, %p60_p10  ;;  %s227_s17 = sand.u32 1, %s1650_s20  }
  0x1f   : > { %s1304_s25 = sshll.u32 %s227_s17, 2  ;;  %s1305_s26 = sshll.u32 %s1658_s22, 2 }
  0x20   : > { %s2081_s0 = sld [smem:[#allocation15_spill]]  ;;  %s231_s6 = scalar_lea.vmem [#allocation2], %s1304_s25 }
  0x21   : > { %s240_s7 = sshll.u32 %s231_s6, 4  ;;  %p1354_p8 = pnand %p1368_p5, %p1763_p11  ;;  %s241_s7 = int_to_ptr.vmem [resolvable:$true] %s240_s7 }
  0x22   : > { %s228_s10 = scalar_lea.sflag [#allocation3], %s227_s17  ;;  %s1800_s8 = sand.u32 (!%p1744_p3), 1, %s1646_s19  }
  0x23   : > { %s1307_s27 = sshll.u32 (!%p1744_p3), %s1800_s8, 2 }
  0x24   : > { %249 = sbr.rel (%p1744_p3) target bundleno = 848 (0x350), region = 32  ;;  %s255_s25 = scalar_lea.vmem (!%p1744_p3), [#allocation2], %s1307_s27 }
  0x26   : > { %s236_s30 = scalar_lea.hbm %s2081_s0, %s1305_s26  ;;  %s252_s26 = scalar_lea.sflag (!%p1744_p3), [#allocation3], %s1800_s8 }
  0x27   : > { %s238_s13 = sshll.u32 %s236_s30, 4  ;;  %s239_s13 = int_to_ptr.hbm [resolvable:$true] %s238_s13 }
  0x28   : > { %1356 = dma.hbm_to_vmem [thread:$0]  (!%p1354_p8), %s239_s13, 64, %s241_s7, %s228_s10  }
  0x29   : > { %1625 = dma.done.wait (%p1769_p12), %s252_s26, 64  }
  0x2a   : > { %1627 = vsyncadd (%p1769_p12), %s252_s26, 4294967232 }
  0x2b   : > { %1629 = dma.done.wait (%p61_p1), [#allocation6], 256  }
  0x2c   : > { %1631 = vsyncadd (%p61_p1), [#allocation6], 4294967040  ;;  %v1333_v0 = vld [vmem:[#allocation5 + $0x8] sm:$0xff]  ;;  %v1332_v1 = vld [vmem:[#allocation5] sm:$0xff]  ;;  %vm320_vm0 = vcmask 261120   ;;  %s2082_s2 = sld [smem:[#allocation17_spill]] }
  0x2d   : > { %330 = vmatpush.bf16.msra.mxu0 %v1333_v0  ;;  %v299_v2 = vld [vmem:[%s255_s25] sm:$0xf]  ;;  %s1667_s12 = smov 104   ;;  %s1668_s17 = smov 120   ;;  %v1672_v8 = vmov 1983009808  }
  0x2e   : > { %s1669_s29 = smov 96   ;;  %s1670_s30 = smov 112   ;;  %v359_v9 = vunpack.c.l.s4 %v1672_v8  ;;  %v1673_v17 = vmov 1934713408   ;;  %vm368_vm1 = vcmask 1047556   ;;  %vm608_vm2 = vcmask 60416  }
  0x2f   : > { %s2070_s6 = smov 64   ;;  %v373_v18 = vunpack.c.l.s4 %v1673_v17  ;;  %s1850_s7 = sshll.u32 %s1800_s8, 4 }
  0x30   : > { %v1817_v13 = vunpack.c.0.s8 %v359_v9  ;;  %s1857_s13 = scalar_lea.vmem [#allocation7], %s1850_s7  ;;  %s1914_s10 = scalar_lea.vmem [#allocation10], %s1850_s7 }
  0x31   : > { %331 = vmatpush.bf16.msra.mxu0 %v1332_v1  ;;  %v1822_v25 = vunpack.c.0.s8 %v373_v18  ;;  %s1945_s27 = sshll.u32 %s1654_s21, 4  ;;  %s1099_s11 = sshll.u32 %s1857_s13, 4  ;;  %s1100_s11 = int_to_ptr.vmem [resolvable:$true] %s1099_s11 }
  0x32   : > { %v1455_v3 = vld [vmem:[%s2082_s2] ss:$0 sm:$0xff]  ;;  %s1098_s28 = scalar_lea.hbm %s2066_s3, %s1945_s27  ;;  %s1536_s0 = scalar_lea.hbm %s2066_s3, 32 }
  0x34   : > { %1320 = vmatmul.msk.bf16.vlgmr.msra.gmra.mxu0 %vm320_vm0, %v299_v2 }
  0xb1   : > { %v333_v4 = vpop.f32.mrf.mxu0 }
  0xb2   : > { %v334_v5 = vadd.f32 %v1455_v3, %v333_v4 }
  0xb4   : > { %v337_v6 = vpack.c.bf16 %v334_v5, %v334_v5 }
  0xb6   : > { %343 = vrot.lane.b32.xlu1 %v337_v6, %s1667_s12  ;;  %339 = vrot.lane.b32.xlu0 %v337_v6, %s1668_s17  ;;  %v348_v15 = vshrl.u32 %v337_v6, 16  ;;  %s1101_s12 = sshll.u32 %s1098_s28, 4  ;;  %s1076_s17 = scalar_lea.sflag [#allocation4], %s1800_s8  ;;  %s1102_s12 = int_to_ptr.hbm [resolvable:$true] %s1101_s12 }
  0xb9   : > { %v335_v7 = vpop.f32.mrf.mxu0 }
  0xbe   : > { %410 = vrot.lane.b32.xlu1 %v337_v6, %s1669_s29  ;;  %341 = vrot.lane.b32.xlu0 %v337_v6, %s1670_s30 }
  0xc6   : > { %482 = vrot.lane.b32.xlu1 %v337_v6, %s2070_s6 }
 0x128   : > { %v344_v10 = vpop.permute.xlu1 %343  ;;  %v340_v11 = vpop.permute.xlu0 %339 }
 0x129   : > { %v349_v12 = vshrl.u32 %v340_v11, 16  ;;  %488 = vrot.lane.b32.xlu1 %v344_v10, %s2070_s6  ;;  %416 = vrot.lane.b32.xlu0 %v344_v10, %s1669_s29  ;;  %v347_v14 = vpack.i.b16 %v340_v11, %v337_v6  ;;  %v355_v21 = vshrl.u32 %v344_v10, 16 }
 0x12a   : > { %412 = vrot.lane.b32.xlu2 %v340_v11, %s1669_s29 }
 0x12b   : > { %v350_v16 = vpack.i.b16 %v349_v12, %v348_v15  ;;  %v361_v19 = vperm.slane %v347_v14, %v1817_v13 }
 0x12d   : > { %v388_v22 = vperm.slane %v350_v16, %v1817_v13  ;;  %v370_v26 = vrot.slane %v361_v19, 4 }
 0x12f   : > { %v396_v29 = vrot.slane %v388_v22, 4 }
 0x130   : > { %v342_v20 = vpop.permute.xlu0 %341  ;;  %v411_v16 = vpop.permute.xlu1 %410 }
 0x131   : > { %v353_v23 = vpack.i.b16 %v344_v10, %v342_v20  ;;  %v354_v24 = vshrl.u32 %v342_v20, 16  ;;  %486 = vrot.lane.b32.xlu0 %v342_v20, %s2070_s6  ;;  %v421_v18 = vshrl.u32 %v411_v16, 16 }
 0x132   : > { %414 = vrot.lane.b32.xlu2 %v342_v20, %s1669_s29  ;;  %s1530_s29 = sshra.s32 %s1102_s12, 4  ;;  %s1531_s29 = int_to_ptr.hbm [resolvable:$true] %s1530_s29 }
 0x133   : > { %v356_v27 = vpack.i.b16 %v355_v21, %v354_v24  ;;  %v366_v28 = vperm.slane %v353_v23, %v1817_v13  ;;  %s1532_s30 = scalar_lea.hbm %s1531_s29, 16  ;;  %p1537_p10 = scmp.lt.s32.totalorder %s1531_s29, %s2066_s3 }
 0x134   : > { %p1533_p1 = scmp.ne.s32.totalorder %s1531_s29, %s1532_s30  ;;  %p1538_p11 = scmp.lt.s32.totalorder %s1536_s0, %s1532_s30 }
 0x135   : > { %v367_v30 = vrot.slane %v366_v28, 4  ;;  %v371_v31 = vsel %vm368_vm1, %v366_v28, %v370_v26  ;;  %v393_v32 = vperm.slane %v356_v27, %v1817_v13 }
 0x136   : > { %v379_v33 = vperm.slane %v371_v31, %v1822_v25  ;;  %p1534_p3 = pnand %p1533_p1, %p1778_p4  ;;  %p1539_p12 = por %p1538_p11, %p1537_p10 }
 0x137   : > { %v369_v34 = vsel %vm368_vm1, %v367_v30, %v361_v19  ;;  %v394_v35 = vrot.slane %v393_v32, 4  ;;  %v397_v36 = vsel %vm368_vm1, %v393_v32, %v396_v29 }
 0x138   : > { %v375_v37 = vperm.slane %v369_v34, %v1822_v25  ;;  %v382_v38 = vrot.slane %v379_v33, 4  ;;  %v405_v39 = vperm.slane %v397_v36, %v1822_v25  ;;  %p1535_p9 = pneg %p1534_p3 }
 0x139   : > { %v395_v40 = vsel %vm368_vm1, %v394_v35, %v388_v22  ;;  %v483_v22 = vpop.permute.xlu1 %482 }
 0x13a   : > { %v380_v41 = vrot.slane %v375_v37, 4  ;;  %v383_v42 = vsel %vm368_vm1, 0, %v382_v38  ;;  %v401_v43 = vperm.slane %v395_v40, %v1822_v25  ;;  %v408_v44 = vrot.slane %v405_v39, 4  ;;  %484 = vrot.lane.b32.xlu2 %v340_v11, %s2070_s6  ;;  %p1540_p13 = pnand %p1539_p12, %p1535_p9 }
 0x13b   : > { %v559_v45 = vrot.slane %v383_v42, 4  ;;  %v554_v49 = vsel %vm368_vm1, %v382_v38, %v375_v37  ;;  %v493_v31 = vshrl.u32 %v483_v22, 16 }
 0x13c   : > { %v381_v46 = vsel %vm368_vm1, 0, %v380_v41  ;;  %v406_v47 = vrot.slane %v401_v43, 4  ;;  %v409_v48 = vsel %vm368_vm1, 0, %v408_v44  ;;  %v573_v54 = vsel %vm368_vm1, %v408_v44, %v401_v43 }
 0x13d   : > { %v560_v50 = vsel %vm368_vm1, %v559_v45, %v381_v46  ;;  %v578_v51 = vrot.slane %v409_v48, 4  ;;  %v558_v56 = vperm.slane %v554_v49, %v1817_v13  ;;  %v577_v60 = vperm.slane %v573_v54, %v1817_v13 }
 0x13e   : > { %v407_v52 = vsel %vm368_vm1, 0, %v406_v47  ;;  %v564_v53 = vperm.slane %v560_v50, %v1817_v13 }
 0x13f   : > { %v579_v55 = vsel %vm368_vm1, %v578_v51, %v407_v52 }
 0x140   : > { %v565_v57 = vrot.slane %v564_v53, 4  ;;  %v583_v58 = vperm.slane %v579_v55, %v1817_v13 }
 0x142   : > { %v566_v59 = vsel %vm368_vm1, %v565_v57, %v558_v56  ;;  %v584_v61 = vrot.slane %v583_v58, 4 }
 0x143   : > { %v570_v62 = vperm.slane %v566_v59, %v1822_v25 }
 0x144   : > { %v585_v63 = vsel %vm368_vm1, %v584_v61, %v577_v60 }
 0x145   : > { %v571_v0 = vrot.slane %v570_v62, 4  ;;  %v589_v1 = vperm.slane %v585_v63, %v1822_v25  ;;  %v596_v2 = vshrl.u32 %v570_v62, 16 }
 0x147   : > { %v572_v3 = vsel %vm368_vm1, 0, %v571_v0  ;;  %v590_v4 = vrot.slane %v589_v1, 4  ;;  %v594_v5 = vpack.i.b16 %v589_v1, %v570_v62  ;;  %v597_v6 = vshrl.u32 %v589_v1, 16 }
 0x148   : > { %v604_v10 = vshrl.u32 %v572_v3, 16 }
 0x149   : > { %v591_v7 = vsel %vm368_vm1, 0, %v590_v4  ;;  %v598_v8 = vpack.i.b16 %v597_v6, %v596_v2  ;;  %609 = vst.msk [vmem:[%s1857_s13] sm:$0xf] %vm608_vm2, %v594_v5 }
 0x14a   : > { %v602_v9 = vpack.i.b16 %v591_v7, %v572_v3  ;;  %v605_v11 = vshrl.u32 %v591_v7, 16 }
 0x14b   : > { %610 = vst.msk [vmem:[%s1857_s13 + $0x4] sm:$0xf] %vm608_vm2, %v598_v8 }
 0x14c   : > { %v606_v12 = vpack.i.b16 %v605_v11, %v604_v10  ;;  %611 = vst.msk [vmem:[%s1857_s13 + $0x8] sm:$0xf] %vm608_vm2, %v602_v9 }
 0x14e   : > { %612 = vst.msk [vmem:[%s1857_s13 + $0xc] sm:$0xf] %vm608_vm2, %v606_v12 }
 0x184   : > { %v413_v14 = vpop.permute.xlu2 %412 }
 0x185   : > { %v422_v17 = vshrl.u32 %v413_v14, 16  ;;  %v420_v19 = vpack.i.b16 %v413_v14, %v411_v16 }
 0x187   : > { %v423_v20 = vpack.i.b16 %v422_v17, %v421_v18  ;;  %v434_v23 = vperm.slane %v420_v19, %v1817_v13 }
 0x189   : > { %v460_v27 = vperm.slane %v423_v20, %v1817_v13  ;;  %v442_v32 = vrot.slane %v434_v23, 4 }
 0x18b   : > { %v468_v37 = vrot.slane %v460_v27, 4 }
 0x18c   : > { %v415_v15 = vpop.permute.xlu2 %414 }
 0x18d   : > { %v427_v28 = vshrl.u32 %v415_v15, 16 }
 0x194   : > { %v485_v21 = vpop.permute.xlu2 %484 }
 0x195   : > { %v494_v24 = vshrl.u32 %v485_v21, 16  ;;  %v492_v33 = vpack.i.b16 %v485_v21, %v483_v22 }
 0x197   : > { %v495_v36 = vpack.i.b16 %v494_v24, %v493_v31  ;;  %v506_v43 = vperm.slane %v492_v33, %v1817_v13 }
 0x199   : > { %v532_v47 = vperm.slane %v495_v36, %v1817_v13  ;;  %v514_v59 = vrot.slane %v506_v43, 4 }
 0x19b   : > { %v417_v26 = vpop.permute.xlu0 %416  ;;  %v489_v41 = vpop.permute.xlu1 %488  ;;  %v540_v63 = vrot.slane %v532_v47, 4 }
 0x19c   : > { %v426_v29 = vpack.i.b16 %v417_v26, %v415_v15  ;;  %v428_v30 = vshrl.u32 %v417_v26, 16  ;;  %v500_v52 = vshrl.u32 %v489_v41, 16 }
 0x19e   : > { %v429_v34 = vpack.i.b16 %v428_v30, %v427_v28  ;;  %v439_v35 = vperm.slane %v426_v29, %v1817_v13 }
 0x1a0   : > { %v440_v38 = vrot.slane %v439_v35, 4  ;;  %v465_v39 = vperm.slane %v429_v34, %v1817_v13  ;;  %v443_v40 = vsel %vm368_vm1, %v439_v35, %v442_v32 }
 0x1a1   : > { %v451_v42 = vperm.slane %v443_v40, %v1822_v25 }
 0x1a2   : > { %v466_v44 = vrot.slane %v465_v39, 4  ;;  %v469_v45 = vsel %vm368_vm1, %v465_v39, %v468_v37  ;;  %v441_v46 = vsel %vm368_vm1, %v440_v38, %v434_v23 }
 0x1a3   : > { %v487_v48 = vpop.permute.xlu0 %486  ;;  %v454_v49 = vrot.slane %v451_v42, 4  ;;  %v477_v50 = vperm.slane %v469_v45, %v1822_v25  ;;  %v447_v51 = vperm.slane %v441_v46, %v1822_v25 }
 0x1a4   : > { %v498_v53 = vpack.i.b16 %v489_v41, %v487_v48  ;;  %v499_v54 = vshrl.u32 %v487_v48, 16  ;;  %v467_v55 = vsel %vm368_vm1, %v466_v44, %v460_v27 }
 0x1a5   : > { %v455_v56 = vsel %vm368_vm1, 0, %v454_v49  ;;  %v473_v57 = vperm.slane %v467_v55, %v1822_v25  ;;  %v452_v58 = vrot.slane %v447_v51, 4  ;;  %v480_v29 = vrot.slane %v477_v50, 4 }
 0x1a6   : > { %v501_v60 = vpack.i.b16 %v500_v52, %v499_v54  ;;  %v511_v61 = vperm.slane %v498_v53, %v1817_v13  ;;  %1437 = vxpose.binary.xlu1.c.b16.start.end [1/2] (short) (narrow) %v455_v56, %v477_v50, 16 }
 0x1a7   : > { %1431 = vxpose.binary.xlu2.c.b16.start.end [1/2] (short) (narrow) %v473_v57, %v447_v51, 16  ;;  %v453_v62 = vsel %vm368_vm1, 0, %v452_v58  ;;  %v478_v28 = vrot.slane %v473_v57, 4  ;;  %v481_v38 = vsel %vm368_vm1, 0, %v480_v29 }
 0x1a8   : > { %v512_v0 = vrot.slane %v511_v61, 4  ;;  %v515_v1 = vsel %vm368_vm1, %v511_v61, %v514_v59  ;;  %v537_v2 = vperm.slane %v501_v60, %v1817_v13  ;;  %1434 = vxpose.binary.xlu0.c.b16.start.end [1/2] (short) (narrow) %v451_v42, %v453_v62, 16 }
 0x1a9   : > { %v523_v3 = vperm.slane %v515_v1, %v1822_v25  ;;  %v479_v37 = vsel %vm368_vm1, 0, %v478_v28 }
 0x1aa   : > { %v513_v4 = vsel %vm368_vm1, %v512_v0, %v506_v43  ;;  %v538_v5 = vrot.slane %v537_v2, 4  ;;  %v541_v6 = vsel %vm368_vm1, %v537_v2, %v540_v63 }
 0x1ab   : > { %v519_v7 = vperm.slane %v513_v4, %v1822_v25  ;;  %v526_v8 = vrot.slane %v523_v3, 4  ;;  %v549_v9 = vperm.slane %v541_v6, %v1822_v25 }
 0x1ac   : > { %v539_v10 = vsel %vm368_vm1, %v538_v5, %v532_v47 }
 0x1ad   : > { %v524_v11 = vrot.slane %v519_v7, 4  ;;  %v527_v12 = vsel %vm368_vm1, 0, %v526_v8  ;;  %v545_v14 = vperm.slane %v539_v10, %v1822_v25  ;;  %v552_v15 = vrot.slane %v549_v9, 4 }
 0x1ae   : > { %v1022_v16 = vrot.slane %v527_v12, 4  ;;  %v1017_v20 = vsel %vm368_vm1, %v526_v8, %v519_v7 }
 0x1af   : > { %v525_v17 = vsel %vm368_vm1, 0, %v524_v11  ;;  %v550_v18 = vrot.slane %v545_v14, 4  ;;  %v553_v19 = vsel %vm368_vm1, 0, %v552_v15  ;;  %v1036_v26 = vsel %vm368_vm1, %v552_v15, %v545_v14 }
 0x1b0   : > { %v1023_v21 = vsel %vm368_vm1, %v1022_v16, %v525_v17  ;;  %v1041_v22 = vrot.slane %v553_v19, 4  ;;  %v1021_v30 = vperm.slane %v1017_v20, %v1817_v13  ;;  %v1040_v34 = vperm.slane %v1036_v26, %v1817_v13 }
 0x1b1   : > { %v551_v23 = vsel %vm368_vm1, 0, %v550_v18  ;;  %v1027_v24 = vperm.slane %v1023_v21, %v1817_v13 }
 0x1b2   : > { %v1042_v27 = vsel %vm368_vm1, %v1041_v22, %v551_v23 }
 0x1b3   : > { %v1028_v31 = vrot.slane %v1027_v24, 4  ;;  %v1046_v32 = vperm.slane %v1042_v27, %v1817_v13 }
 0x1b5   : > { %v1029_v33 = vsel %vm368_vm1, %v1028_v31, %v1021_v30  ;;  %v1047_v35 = vrot.slane %v1046_v32, 4 }
 0x1b6   : > { %v1033_v36 = vperm.slane %v1029_v33, %v1822_v25 }
 0x1b7   : > { %v1048_v39 = vsel %vm368_vm1, %v1047_v35, %v1040_v34  ;;  %1440 = vxpose.binary.xlu2.c.b16.start.end [1/2] (short) (narrow) %v479_v37, %v481_v38, 16 }
 0x1b8   : > { %v1034_v40 = vrot.slane %v1033_v36, 4  ;;  %v1052_v41 = vperm.slane %v1048_v39, %v1822_v25  ;;  %v1059_v42 = vshrl.u32 %v1033_v36, 16 }
 0x1ba   : > { %v1035_v43 = vsel %vm368_vm1, 0, %v1034_v40  ;;  %v1053_v44 = vrot.slane %v1052_v41, 4  ;;  %v1057_v45 = vpack.i.b16 %v1052_v41, %v1033_v36  ;;  %v1060_v46 = vshrl.u32 %v1052_v41, 16 }
 0x1bb   : > { %v1067_v50 = vshrl.u32 %v1035_v43, 16 }
 0x1bc   : > { %v1054_v47 = vsel %vm368_vm1, 0, %v1053_v44  ;;  %v1061_v48 = vpack.i.b16 %v1060_v46, %v1059_v42  ;;  %1071 = vst.msk [vmem:[%s1914_s10] sm:$0xf] %vm608_vm2, %v1057_v45 }
 0x1bd   : > { %v1065_v49 = vpack.i.b16 %v1054_v47, %v1035_v43  ;;  %v1068_v51 = vshrl.u32 %v1054_v47, 16 }
 0x1be   : > { %1072 = vst.msk [vmem:[%s1914_s10 + $0x4] sm:$0xf] %vm608_vm2, %v1061_v48 }
 0x1bf   : > { %v1069_v52 = vpack.i.b16 %v1068_v51, %v1067_v50  ;;  %1073 = vst.msk [vmem:[%s1914_s10 + $0x8] sm:$0xf] %vm608_vm2, %v1065_v49 }
 0x1c1   : > { %1074 = vst.msk [vmem:[%s1914_s10 + $0xc] sm:$0xf] %vm608_vm2, %v1069_v52 }
 0x248   : > { %v1432_v53 = vpop.trf.xlu2 }
 0x250   : > { %v1433_v54 = vpop.trf.xlu2 }
 0x252   : > { %v1438_v55 = vpop.trf.xlu1 }
 0x253   : > { %v769_v57 = vrot.slane %v1438_v55, 4 }
 0x254   : > { %v1435_v56 = vpop.trf.xlu0 }
 0x255   : > { %v770_v60 = vsel %vm368_vm1, %v769_v57, %v1433_v54 }
 0x256   : > { %v774_v1 = vperm.slane %v770_v60, %v1817_v13 }
 0x258   : > { %v1441_v58 = vpop.trf.xlu2  ;;  %v783_v9 = vrot.slane %v774_v1, 4 }
 0x259   : > { %v775_v3 = vrot.slane %v1441_v58, 4 }
 0x25a   : > { %v1439_v59 = vpop.trf.xlu1 }
 0x25b   : > { %v747_v61 = vrot.slane %v1439_v59, 4 }
 0x25c   : > { %v1436_v62 = vpop.trf.xlu0 }
 0x25d   : > { %v748_v63 = vsel %vm368_vm1, %v747_v61, %v1435_v56  ;;  %v741_v0 = vrot.slane %v1436_v62, 4 }
 0x25e   : > { %v752_v2 = vperm.slane %v748_v63, %v1817_v13 }
 0x25f   : > { %v742_v4 = vsel %vm368_vm1, %v741_v0, %v1432_v53 }
 0x260   : > { %v753_v5 = vrot.slane %v752_v2, 4  ;;  %v746_v6 = vperm.slane %v742_v4, %v1817_v13  ;;  %v1442_v7 = vpop.trf.xlu2 }
 0x261   : > { %v776_v8 = vsel %vm368_vm1, %v775_v3, %v1442_v7 }
 0x262   : > { %v755_v10 = vrot.slane %v746_v6, 4  ;;  %v780_v11 = vperm.slane %v776_v8, %v1817_v13  ;;  %v754_v12 = vsel %vm368_vm1, %v753_v5, %v746_v6 }
 0x263   : > { %v760_v19 = vperm.slane %v754_v12, %v1822_v25 }
 0x264   : > { %v781_v14 = vrot.slane %v780_v11, 4  ;;  %v784_v15 = vsel %vm368_vm1, %v780_v11, %v783_v9  ;;  %v756_v16 = vsel %vm368_vm1, %v752_v2, %v755_v10 }
 0x265   : > { %v792_v17 = vperm.slane %v784_v15, %v1822_v25  ;;  %v764_v18 = vperm.slane %v756_v16, %v1822_v25  ;;  %v801_v29 = vshrl.u32 %v760_v19, 16  ;;  %v765_v40 = vrot.slane %v760_v19, 4 }
 0x266   : > { %v782_v20 = vsel %vm368_vm1, %v781_v14, %v774_v1 }
 0x267   : > { %v817_v21 = vshrl.u32 %v764_v18, 16  ;;  %v818_v22 = vshrl.u32 %v792_v17, 16  ;;  %v788_v23 = vperm.slane %v782_v20, %v1822_v25  ;;  %v767_v24 = vrot.slane %v764_v18, 4 }
 0x268   : > { %v795_v26 = vrot.slane %v792_v17, 4  ;;  %v815_v27 = vpack.i.b16 %v792_v17, %v764_v18  ;;  %v766_v42 = vsel %vm368_vm1, 0, %v765_v40 }
 0x269   : > { %v819_v28 = vpack.i.b16 %v818_v22, %v817_v21  ;;  %v802_v30 = vshrl.u32 %v788_v23, 16  ;;  %v768_v31 = vsel %vm368_vm1, 0, %v767_v24  ;;  %v799_v33 = vpack.i.b16 %v788_v23, %v760_v19 }
 0x26a   : > { %v796_v32 = vsel %vm368_vm1, 0, %v795_v26  ;;  %v825_v35 = vshrl.u32 %v768_v31, 16  ;;  %v793_v39 = vrot.slane %v788_v23, 4  ;;  %v809_v44 = vshrl.u32 %v766_v42, 16 }
 0x26b   : > { %1452 = vxpose.binary.xlu1.c.b16.start.end [1/2] (short) (narrow) %v819_v28, %v815_v27, 16  ;;  %v803_v34 = vpack.i.b16 %v802_v30, %v801_v29  ;;  %v826_v36 = vshrl.u32 %v796_v32, 16  ;;  %v823_v37 = vpack.i.b16 %v796_v32, %v768_v31 }
 0x26c   : > { %v794_v41 = vsel %vm368_vm1, 0, %v793_v39 }
 0x26d   : > { %1443 = vxpose.binary.xlu0.c.b16.start.end [1/2] (short) (narrow) %v803_v34, %v799_v33, 16  ;;  %v827_v38 = vpack.i.b16 %v826_v36, %v825_v35  ;;  %v810_v43 = vshrl.u32 %v794_v41, 16  ;;  %v807_v45 = vpack.i.b16 %v794_v41, %v766_v42 }
 0x26f   : > { %1446 = vxpose.binary.xlu2.c.b16.start.end [1/2] (short) (narrow) %v827_v38, %v823_v37, 16  ;;  %v811_v46 = vpack.i.b16 %v810_v43, %v809_v44 }
 0x27d   : > { %1449 = vxpose.binary.xlu0.c.b16.start.end [1/2] (short) (narrow) %v811_v46, %v807_v45, 16 }
 0x27e   : > { %1543 = shalt.err (!%p1540_p13)
}
 0x27f   : > { %s1674_s8 = smov 4   ;;  %s2083_s13 = smov 64  }
 0x280   : > { %1343 = dma.vmem_to_hbm [thread:$0]  (%p1778_p4), %s1100_s11, 256, %s1102_s12, %s1076_s17, %s2083_s13, %s2083_s13, %s1674_s8  }
 0x281   : > { %s1116_s2 = scalar_lea.hbm %s2067_s4, %s1945_s27  ;;  %s1134_s25 = scalar_lea.hbm %s2068_s5, %s1945_s27 }
 0x282   : > { %s1080_s28 = sand.u32 1, %s1736_s24   ;;  %s290_s11 = scalar_lea.vmem [#allocation8], %s1850_s7 }
 0x283   : > { %s1117_s12 = sshll.u32 %s290_s11, 4  ;;  %s1991_s17 = sshll.u32 %s1116_s2, 4  ;;  %s1118_s12 = int_to_ptr.vmem [resolvable:$true] %s1117_s12  ;;  %s1120_s17 = int_to_ptr.hbm [resolvable:$true] %s1991_s17 }
 0x284   : > { %s1993_s29 = sshll.u32 %s1134_s25, 4  ;;  %s1135_s30 = sshll.u32 %s1914_s10, 4  ;;  %s1999_s30 = int_to_ptr.vmem [resolvable:$true] %s1135_s30  ;;  %s1138_s29 = int_to_ptr.hbm [resolvable:$true] %s1993_s29 }
 0x285   : > { %s2003_s24 = scalar_lea.sflag [#allocation9], %s1080_s28  ;;  %s1558_s7 = sshra.s32 %s1120_s17, 4  ;;  %s1559_s7 = int_to_ptr.hbm [resolvable:$true] %s1558_s7 }
 0x286   : > { %s1560_s27 = scalar_lea.hbm %s1559_s7, 16  ;;  %s1564_s0 = scalar_lea.hbm %s2067_s4, 32 }
 0x287   : > { %p1561_p0 = scmp.ne.s32.totalorder %s1559_s7, %s1560_s27  ;;  %p1565_p8 = scmp.lt.s32.totalorder %s1559_s7, %s2067_s4 }
 0x288   : > { %p1566_p1 = scmp.lt.s32.totalorder %s1564_s0, %s1560_s27 }
 0x289   : > { %p1562_p2 = pnand %p1561_p0, %p1778_p4 }
 0x28a   : > { %p1567_p3 = por %p1566_p1, %p1565_p8 }
 0x28b   : > { %p1563_p5 = pneg %p1562_p2 }
 0x28d   : > { %p1568_p9 = pnand %p1567_p3, %p1563_p5 }
 0x310   : > { %v1447_v48 = vpop.trf.xlu2 }
 0x311   : > { %v963_v52 = vrot.slane %v1447_v48, 4 }
 0x317   : > { %v1453_v49 = vpop.trf.xlu1 }
 0x318   : > { %v957_v51 = vrot.slane %v1453_v49, 4  ;;  %v1448_v58 = vpop.trf.xlu2 }
 0x319   : > { %v1444_v47 = vpop.trf.xlu0  ;;  %v983_v62 = vrot.slane %v1448_v58, 4 }
 0x31a   : > { %v958_v54 = vsel %vm368_vm1, %v957_v51, %v1444_v47 }
 0x31b   : > { %v962_v59 = vperm.slane %v958_v54, %v1817_v13 }
 0x31f   : > { %v1454_v56 = vpop.trf.xlu1 }
 0x320   : > { %v977_v61 = vrot.slane %v1454_v56, 4 }
 0x321   : > { %v1445_v50 = vpop.trf.xlu0 }
 0x322   : > { %v978_v1 = vsel %vm368_vm1, %v977_v61, %v1445_v50 }
 0x323   : > { %v982_v5 = vperm.slane %v978_v1, %v1817_v13 }
 0x329   : > { %v1450_v53 = vpop.trf.xlu0 }
 0x32a   : > { %v964_v55 = vsel %vm368_vm1, %v963_v52, %v1450_v53 }
 0x32b   : > { %v968_v57 = vperm.slane %v964_v55, %v1817_v13 }
 0x32d   : > { %v969_v60 = vrot.slane %v968_v57, 4 }
 0x32f   : > { %v970_v63 = vsel %vm368_vm1, %v969_v60, %v962_v59 }
 0x330   : > { %v974_v2 = vperm.slane %v970_v63, %v1822_v25 }
 0x331   : > { %v1451_v0 = vpop.trf.xlu0 }
 0x332   : > { %v984_v3 = vsel %vm368_vm1, %v983_v62, %v1451_v0  ;;  %v975_v7 = vrot.slane %v974_v2, 4  ;;  %v1001_v10 = vshrl.u32 %v974_v2, 16 }
 0x333   : > { %v988_v4 = vperm.slane %v984_v3, %v1817_v13 }
 0x334   : > { %v976_v11 = vsel %vm368_vm1, 0, %v975_v7 }
 0x335   : > { %v989_v6 = vrot.slane %v988_v4, 4 }
 0x337   : > { %v990_v8 = vsel %vm368_vm1, %v989_v6, %v982_v5 }
 0x338   : > { %v994_v9 = vperm.slane %v990_v8, %v1822_v25  ;;  %v1009_v25 = vshrl.u32 %v976_v11, 16 }
 0x33a   : > { %v995_v12 = vrot.slane %v994_v9, 4  ;;  %v999_v14 = vpack.i.b16 %v994_v9, %v974_v2  ;;  %v1002_v15 = vshrl.u32 %v994_v9, 16 }
 0x33c   : > { %v996_v13 = vsel %vm368_vm1, 0, %v995_v12  ;;  %v1003_v16 = vpack.i.b16 %v1002_v15, %v1001_v10  ;;  %1013 = vst.msk [vmem:[%s290_s11] sm:$0xf] %vm608_vm2, %v999_v14 }
 0x33d   : > { %v1007_v17 = vpack.i.b16 %v996_v13, %v976_v11  ;;  %v1010_v18 = vshrl.u32 %v996_v13, 16 }
 0x33e   : > { %1014 = vst.msk [vmem:[%s290_s11 + $0x4] sm:$0xf] %vm608_vm2, %v1003_v16 }
 0x33f   : > { %v1011_v19 = vpack.i.b16 %v1010_v18, %v1009_v25  ;;  %1015 = vst.msk [vmem:[%s290_s11 + $0x8] sm:$0xf] %vm608_vm2, %v1007_v17 }
 0x341   : > { %1016 = vst.msk [vmem:[%s290_s11 + $0xc] sm:$0xf] %vm608_vm2, %v1011_v19 }
 0x342   : > { %1571 = shalt.err (!%p1568_p9)
}
 0x343   : > { %1344 = dma.vmem_to_hbm [thread:$0]  (%p1778_p4), %s1118_s12, 256, %s1120_s17, %s2003_s24, %s2083_s13, %s2083_s13, %s1674_s8  }
 0x344   : > { %s1586_s6 = sshra.s32 %s1138_s29, 4  ;;  %s1592_s11 = scalar_lea.hbm %s2068_s5, 32  ;;  %s1587_s6 = int_to_ptr.hbm [resolvable:$true] %s1586_s6 }
 0x345   : > { %s1588_s26 = scalar_lea.hbm %s1587_s6, 16  ;;  %p1593_p13 = scmp.lt.s32.totalorder %s1587_s6, %s2068_s5 }
 0x346   : > { %p1589_p10 = scmp.ne.s32.totalorder %s1587_s6, %s1588_s26  ;;  %p1594_p0 = scmp.lt.s32.totalorder %s1592_s11, %s1588_s26 }
 0x348   : > { %p1590_p11 = pnand %p1589_p10, %p1778_p4  ;;  %p1595_p2 = por %p1594_p0, %p1593_p13 }
 0x34a   : > { %p1591_p12 = pneg %p1590_p11 }
 0x34c   : > { %p1596_p5 = pnand %p1595_p2, %p1591_p12 }
 0x34e   : > { %1599 = shalt.err (!%p1596_p5)
}
 0x34f   : > { %1345 = dma.vmem_to_hbm [thread:$0]  (%p1778_p4), %s1999_s30, 256, %s1138_s29, %s2003_s24, %s2083_s13, %s2083_s13, %s1674_s8  }
 0x350 PF: > { %s1152_s12 = sand.u32 1, %s1642_s18   ;;  %p1358_p8 = pnand %p1303_p6, %p1786_p7 }
 0x351   : > { %s1153_s17 = scalar_lea.sflag [#allocation4], %s1152_s12 }
 0x352   : > { %p1359_p1 = pneg %p1358_p8 }
 0x354   : > { %1633 = dma.done.wait (%p1359_p1), %s1153_s17, 256  }
 0x355   : > { %1635 = vsyncadd (%p1359_p1), %s1153_s17, 4294967040  ;;  %s2084_s14 = sadd.s32 4294967294, %s1662_s23  }
 0x356   : > { %s1162_s10 = sand.u32 1, %s2084_s14  }
 0x357   : > { %s1163_s21 = scalar_lea.sflag [#allocation9], %s1162_s10 }
 0x358   : > { %1637 = dma.done.wait (%p1359_p1), %s1163_s21, 512  }
 0x359   : > { %1639 = vsyncadd (%p1359_p1), %s1163_s21, 4294966784  ;;  %s26_s23 = sadd.s32 1, %s1662_s23   ;;  %s2085_s18 = smov %s1646_s19 }
 0x35a   : > { %p23_p4 = scmp.ge.s32.totalorder %s26_s23, 4   ;;  %s2086_s19 = smov %s1650_s20 }
 0x35b   : > { %s2087_s20 = smov %s1784_s15  ;;  %s2088_s21 = smov %s1658_s22 }
 0x35c   : > { %s2089_s22 = smov %s2091_s9  ;;  %25 = sbr.rel (!%p23_p4) target bundleno = 13 (0xd), region = 113 }
 0x361   :  { %1179 = vsyncpa [#allocation3], 1 }
 0x362   :  { %1181 = vsyncpa [#allocation3 + $0x1], 1 }
 0x363   :  { %1182 = vsyncpa [#allocation6], 1 }
 0x364   :  { %1183 = vsyncpa [#allocation4], 1 }
 0x365   :  { %1185 = vsyncpa [#allocation4 + $0x1], 1 }
 0x366   :  { %1186 = vsyncpa [#allocation9], 1 }
 0x367   :  { %1188 = vsyncpa [#allocation9 + $0x1], 1 }

</bundles_post_ra>
